<compile_context>
chip_gen: v7x
topology: tpu7x:2x2x1
jax: 0.10.0
libtpu: 0.0.40
codegen_flags: <defaults>
</compile_context>

<pallas_src>
import functools

import jax
import jax.numpy as jnp
from jax import lax
from jax.experimental import pallas as pl
from jax.experimental.pallas import tpu as pltpu

HIDDEN = 128          # matches nn.Linear(in_dim, 128)
_LANE = 128
_SUBLANE = 8
_TARGET_TILE_BYTES = 2 * 1024 * 1024   # ~2 MiB of obs per grid step
_MAX_TILE_ROWS = 8192
_VMEM_BUDGET = 24 * 1024 * 1024        # stay under v7x's 32 MiB scoped default
_VMEM_LIMIT = 32 * 1024 * 1024


def _round_up(x, m):
    return (x + m - 1) // m * m


def _round_down(x, m):
    return max(m, x // m * m)


def _pick_tile_rows(b_rows, in_dim, itemsize, granule, out_bytes_per_row,
                    h_bytes_per_row):
    """Auto-size the batch tile: ~2 MiB of obs, VMEM budget, grid>=2 when possible."""
    tb = _TARGET_TILE_BYTES // max(1, in_dim * itemsize)
    tb = _round_down(min(max(tb, granule), _MAX_TILE_ROWS), granule)
    tb = min(tb, _round_down(b_rows, granule))            # never exceed the batch
    if b_rows >= 2 * granule:                             # v7x: keep both TCs busy
        tb = min(tb, _round_down(b_rows // 2, granule))

    def vmem_bytes(t):
        return (2 * t * in_dim * itemsize          # double-buffered obs tiles
                + 2 * t * out_bytes_per_row        # double-buffered out tiles
                + 2 * HIDDEN * in_dim * itemsize   # (double-buffered) resident w1
                + t * h_bytes_per_row              # f32 hidden intermediate
                + (1 << 20))                       # slack for small operands/scratch

    while tb > granule and vmem_bytes(tb) > _VMEM_BUDGET:
        tb = _round_down(tb // 2, granule)
    return tb


def _value_head_kernel(obs_ref, w1t_ref, b1c_ref, w2c_ref, b2_ref, out_ref):
    """out_dim == 1 head, lane-dense: batch lives on lanes end-to-end."""
    # h_t[h, b] = sum_d w1t[h, d] * obs[b, d]   (A @ B^T; MXU, f32 accumulation)
    h_t = lax.dot_general(
        w1t_ref[...], obs_ref[...],
        dimension_numbers=(((1,), (1,)), ((), ())),
        preferred_element_type=jnp.float32)                 # (HIDDEN, tb)
    h_t = jnp.maximum(h_t + b1c_ref[...], 0.0)              # bias column (HIDDEN, 1)
    # Second linear: VPU multiply + sublane reduction -> (1, tb), lane-dense.
    v = jnp.sum(h_t * w2c_ref[...], axis=0, keepdims=True)
    out_ref[...] = (v + b2_ref[...]).astype(out_ref.dtype)


def _general_kernel(obs_ref, w1_ref, b1_ref, w2_ref, b2_ref, out_ref):
    """General out_dim (and small-batch fallback): two MXU matmuls, f32 accumulation."""
    h = jnp.dot(obs_ref[...], w1_ref[...], preferred_element_type=jnp.float32)
    h = jnp.maximum(h + b1_ref[...], 0.0)
    v = jnp.dot(h, w2_ref[...], preferred_element_type=jnp.float32)
    out_ref[...] = (v + b2_ref[...]).astype(out_ref.dtype)


@functools.partial(jax.jit, static_argnames=("compute_dtype",))
def critic_forward(obs, w1, b1, w2, b2, *, compute_dtype=jnp.bfloat16):
    B, in_dim = obs.shape
    out_dim = w2.shape[-1]
    itemsize = jnp.dtype(compute_dtype).itemsize

    # bf16 (default) halves the dominant obs HBM stream; math after the MXU stays f32.
    obs_c = obs.astype(compute_dtype)
    b1_f = jnp.reshape(b1, (-1,)).astype(jnp.float32)
    b2_f = jnp.reshape(b2, (-1,)).astype(jnp.float32)

    cost = pl.CostEstimate(
        flops=2 * B * in_dim * HIDDEN + 2 * B * HIDDEN * out_dim,
        transcendentals=0,
        bytes_accessed=(B * in_dim * itemsize + in_dim * HIDDEN * itemsize
                        + HIDDEN * out_dim * 4 + (HIDDEN + out_dim) * 4
                        + B * out_dim * 4))
    cparams = pltpu.CompilerParams(
        dimension_semantics=("parallel",),      # independent batch tiles -> both TCs on v7x
        vmem_limit_bytes=_VMEM_LIMIT)

    if out_dim == 1 and B >= _LANE:
        # ---- lane-dense value head (the production path) ----
        tb = _pick_tile_rows(B, in_dim, itemsize, _LANE,
                             out_bytes_per_row=4, h_bytes_per_row=HIDDEN * 4)
        grid = pl.cdiv(B, tb)            # ragged edge handled by partial blocks; no padding
        n_total = grid * tb

        w1t = jnp.transpose(w1).astype(compute_dtype)            # (HIDDEN, in_dim)
        b1c = jnp.reshape(b1_f, (HIDDEN, 1))
        w2c = jnp.reshape(w2, (HIDDEN, 1)).astype(jnp.float32)
        b2s = jnp.reshape(b2_f, (1, 1))

        out = pl.pallas_call(
            _value_head_kernel,
            out_shape=jax.ShapeDtypeStruct((1, n_total), jnp.float32),
            grid=(grid,),
            in_specs=[
                pl.BlockSpec((tb, in_dim), lambda i: (i, 0)),      # batch-tiled, pipelined
                pl.BlockSpec((HIDDEN, in_dim), lambda i: (0, 0)),  # weights VMEM-resident
                pl.BlockSpec((HIDDEN, 1), lambda i: (0, 0)),
                pl.BlockSpec((HIDDEN, 1), lambda i: (0, 0)),
                pl.BlockSpec((1, 1), lambda i: (0, 0)),
            ],
            out_specs=pl.BlockSpec((1, tb), lambda i: (0, i)),     # lane-dense output
            compiler_params=cparams,
            cost_estimate=cost,
        )(obs_c, w1t, b1c, w2c, b2s)
        # Row-major flattening of (1, grid*tb) equals the batch order; trailing
        # entries of the last (partial) tile are garbage and sliced off here.
        return jnp.reshape(out, (n_total, 1))[:B]

    # ---- general out_dim path / small-batch fallback ----
    b_pad = _round_up(B, _SUBLANE)
    if b_pad != B:
        obs_c = jnp.pad(obs_c, ((0, b_pad - B), (0, 0)))   # pad to a sublane multiple only
    tb = _pick_tile_rows(b_pad, in_dim, itemsize, _SUBLANE,
                         out_bytes_per_row=out_dim * 4, h_bytes_per_row=HIDDEN * 4)
    grid = pl.cdiv(b_pad, tb)

    w1_c = w1.astype(compute_dtype)
    b1_row = jnp.reshape(b1_f, (1, HIDDEN))
    w2_f = w2.astype(jnp.float32)
    b2_row = jnp.reshape(b2_f, (1, out_dim))

    out = pl.pallas_call(
        _general_kernel,
        out_shape=jax.ShapeDtypeStruct((b_pad, out_dim), jnp.float32),
        grid=(grid,),
        in_specs=[
            pl.BlockSpec((tb, in_dim), lambda i: (i, 0)),
            pl.BlockSpec((in_dim, HIDDEN), lambda i: (0, 0)),
            pl.BlockSpec((1, HIDDEN), lambda i: (0, 0)),
            pl.BlockSpec((HIDDEN, out_dim), lambda i: (0, 0)),
            pl.BlockSpec((1, out_dim), lambda i: (0, 0)),
        ],
        out_specs=pl.BlockSpec((tb, out_dim), lambda i: (i, 0)),
        compiler_params=cparams,
        cost_estimate=cost,
    )(obs_c, w1_c, b1_row, w2_f, b2_row)
    return out[:B]


def init_params(key, in_dim, out_dim):
    # Mimics PyTorch's default Linear init: U(-1/sqrt(fan_in), 1/sqrt(fan_in)).
    k1, k2, k3, k4 = jax.random.split(key, 4)
    bound1 = 1.0 / jnp.sqrt(in_dim)
    bound2 = 1.0 / jnp.sqrt(HIDDEN)
    w1 = jax.random.uniform(k1, (in_dim, HIDDEN), jnp.float32, -bound1, bound1)
    b1 = jax.random.uniform(k2, (HIDDEN,), jnp.float32, -bound1, bound1)
    w2 = jax.random.uniform(k3, (HIDDEN, out_dim), jnp.float32, -bound2, bound2)
    b2 = jax.random.uniform(k4, (out_dim,), jnp.float32, -bound2, bound2)
    return w1, b1, w2, b2


def _ref_forward(obs, w1, b1, w2, b2):
    h = jnp.maximum(
        jnp.matmul(obs, w1, precision=lax.Precision.HIGHEST) + b1[None, :], 0.0)
    return jnp.matmul(h, w2, precision=lax.Precision.HIGHEST) + b2[None, :]


if __name__ == "__main__":
    key = jax.random.PRNGKey(0)
    k_obs, k_par = jax.random.split(key)

    # 1) Small-batch value head (fallback path), f32 compute.
    B, in_dim = 8, 32
    obs = jax.random.normal(k_obs, (B, in_dim), dtype=jnp.float32)
    w1, b1, w2, b2 = init_params(k_par, in_dim, 1)
    v = critic_forward(obs, w1, b1, w2, b2, compute_dtype=jnp.float32)
    jax.block_until_ready(v)
    assert v.shape == (B, 1)
    assert jnp.allclose(v, _ref_forward(obs, w1, b1, w2, b2), rtol=1e-3, atol=1e-3)

    # 2) Lane-dense value-head path, ragged batch (partial edge tile): f32 + default bf16.
    B2, in_dim2 = 300, 24
    obs2 = jax.random.normal(jax.random.PRNGKey(1), (B2, in_dim2), dtype=jnp.float32)
    w1b, b1b, w2b, b2b = init_params(jax.random.PRNGKey(2), in_dim2, 1)
    ref2 = _ref_forward(obs2, w1b, b1b, w2b, b2b)
    v2 = critic_forward(obs2, w1b, b1b, w2b, b2b, compute_dtype=jnp.float32)
    jax.block_until_ready(v2)
    assert v2.shape == (B2, 1)
    assert jnp.allclose(v2, ref2, rtol=1e-3, atol=1e-3)
    v2_bf = critic_forward(obs2, w1b, b1b, w2b, b2b)   # default bf16 inputs, f32 accumulation
    jax.block_until_ready(v2_bf)
    assert jnp.allclose(v2_bf, ref2, rtol=5e-2, atol=5e-2)

    # 3) General out_dim path with a non-multiple-of-8 batch (pads to 8 only).
    B3, out_dim3 = 13, 8
    obs3 = jax.random.normal(jax.random.PRNGKey(3), (B3, in_dim), dtype=jnp.float32)
    w1c, b1c, w2c, b2c = init_params(jax.random.PRNGKey(4), in_dim, out_dim3)
    v3 = critic_forward(obs3, w1c, b1c, w2c, b2c, compute_dtype=jnp.float32)
    jax.block_until_ready(v3)
    assert v3.shape == (B3, out_dim3)
    assert jnp.allclose(v3, _ref_forward(obs3, w1c, b1c, w2c, b2c), rtol=1e-3, atol=1e-3)

    # TODO(synk): the PyTorch forward's np.ndarray -> torch.tensor conversion is a
    # host-side convenience, not a kernel op; callers pass jnp arrays directly.
    print("KERNEL_OK")
</pallas_src>

<mosaic_0001>
module attributes {stable_mosaic.version = 11 : i64} {
  func.func @_general_kernel(%arg0: i32, %arg1: memref<8x32xf32, #tpu.memory_space<vmem>>, %arg2: memref<32x128xf32, #tpu.memory_space<vmem>>, %arg3: memref<1x128xf32, #tpu.memory_space<vmem>>, %arg4: memref<128x1xf32, #tpu.memory_space<vmem>>, %arg5: memref<1x1xf32, #tpu.memory_space<vmem>>, %arg6: memref<8x1xf32, #tpu.memory_space<vmem>>) attributes {dimension_semantics = [#tpu.dimension_semantics<parallel>], iteration_bounds = array<i64: 1>, scalar_prefetch = 0 : i64, scratch_operands = 0 : i64, tpu.core_type = #tpu.core_type<tc>, window_params = [{transform_indices = @transform_0, window_bounds = array<i64: 8, 32>}, {pipeline_mode = #tpu.pipeline_mode<synchronous>, transform_indices = @transform_1, window_bounds = array<i64: 32, 128>}, {pipeline_mode = #tpu.pipeline_mode<synchronous>, transform_indices = @transform_2, window_bounds = array<i64: 1, 128>}, {pipeline_mode = #tpu.pipeline_mode<synchronous>, transform_indices = @transform_3, window_bounds = array<i64: 128, 1>}, {pipeline_mode = #tpu.pipeline_mode<synchronous>, transform_indices = @transform_4, window_bounds = array<i64: 1, 1>}, {transform_indices = @transform_5, window_bounds = array<i64: 8, 1>}]} {
    %c0 = arith.constant 0 : index
    %c0_0 = arith.constant 0 : index
    %0 = vector.load %arg1[%c0, %c0_0] : memref<8x32xf32, #tpu.memory_space<vmem>>, vector<8x32xf32>
    %c0_1 = arith.constant 0 : index
    %c0_2 = arith.constant 0 : index
    %1 = vector.load %arg2[%c0_1, %c0_2] : memref<32x128xf32, #tpu.memory_space<vmem>>, vector<32x128xf32>
    %cst = arith.constant dense<0.000000e+00> : vector<8x128xf32>
    %2 = tpu.matmul %0, %1, %cst {dimension_numbers = #tpu.dot_dimension_numbers<[1], [0], [0], [1], [0, 0, 1, 1], [], []>} : vector<8x32xf32>, vector<32x128xf32>, vector<8x128xf32> -> vector<8x128xf32>
    %c0_3 = arith.constant 0 : index
    %c0_4 = arith.constant 0 : index
    %3 = vector.load %arg3[%c0_3, %c0_4] : memref<1x128xf32, #tpu.memory_space<vmem>>, vector<1x128xf32>
    %4 = vector.broadcast %3 : vector<1x128xf32> to vector<8x128xf32>
    %5 = arith.addf %2, %4 : vector<8x128xf32>
    %cst_5 = arith.constant 0.000000e+00 : f32
    %6 = vector.broadcast %cst_5 : f32 to vector<8x128xf32>
    %7 = arith.maximumf %5, %6 : vector<8x128xf32>
    %c0_6 = arith.constant 0 : index
    %c0_7 = arith.constant 0 : index
    %8 = vector.load %arg4[%c0_6, %c0_7] : memref<128x1xf32, #tpu.memory_space<vmem>>, vector<128x1xf32>
    %cst_8 = arith.constant dense<0.000000e+00> : vector<8x1xf32>
    %9 = tpu.matmul %7, %8, %cst_8 {dimension_numbers = #tpu.dot_dimension_numbers<[1], [0], [0], [1], [0, 0, 1, 1], [], []>} : vector<8x128xf32>, vector<128x1xf32>, vector<8x1xf32> -> vector<8x1xf32>
    %c0_9 = arith.constant 0 : index
    %c0_10 = arith.constant 0 : index
    %10 = vector.load %arg5[%c0_9, %c0_10] : memref<1x1xf32, #tpu.memory_space<vmem>>, vector<1x1xf32>
    %11 = vector.broadcast %10 : vector<1x1xf32> to vector<8x1xf32>
    %12 = arith.addf %9, %11 : vector<8x1xf32>
    %c0_11 = arith.constant 0 : index
    %c0_12 = arith.constant 0 : index
    %13 = vector.load %arg6[%c0_11, %c0_12] : memref<8x1xf32, #tpu.memory_space<vmem>>, vector<8x1xf32>
    tpu.vector_store %arg6[%c0_11, %c0_12], %12 {strides = array<i32>} : memref<8x1xf32, #tpu.memory_space<vmem>>, vector<8x1xf32>,
    return
  }
  func.func @transform_0(%arg0: i32) -> (i32, i32) {
    %c0_i32 = arith.constant 0 : i32
    %c0_i32_0 = arith.constant 0 : i32
    return %arg0, %c0_i32 : i32, i32
  }
  func.func @transform_1(%arg0: i32) -> (i32, i32) {
    %c0_i32 = arith.constant 0 : i32
    %c0_i32_0 = arith.constant 0 : i32
    %c0_i32_1 = arith.constant 0 : i32
    return %c0_i32, %c0_i32_0 : i32, i32
  }
  func.func @transform_2(%arg0: i32) -> (i32, i32) {
    %c0_i32 = arith.constant 0 : i32
    %c0_i32_0 = arith.constant 0 : i32
    %c0_i32_1 = arith.constant 0 : i32
    return %c0_i32, %c0_i32_0 : i32, i32
  }
  func.func @transform_3(%arg0: i32) -> (i32, i32) {
    %c0_i32 = arith.constant 0 : i32
    %c0_i32_0 = arith.constant 0 : i32
    %c0_i32_1 = arith.constant 0 : i32
    return %c0_i32, %c0_i32_0 : i32, i32
  }
  func.func @transform_4(%arg0: i32) -> (i32, i32) {
    %c0_i32 = arith.constant 0 : i32
    %c0_i32_0 = arith.constant 0 : i32
    %c0_i32_1 = arith.constant 0 : i32
    return %c0_i32, %c0_i32_0 : i32, i32
  }
  func.func @transform_5(%arg0: i32) -> (i32, i32) {
    %c0_i32 = arith.constant 0 : i32
    %c0_i32_0 = arith.constant 0 : i32
    return %arg0, %c0_i32 : i32, i32
  }
}

</mosaic_0001>

<bundles_post_ra>
// kernel: critic_forward.1
= control target key start
LH: loop header
LB: loop body
LE: loop exit
PB: predicated region body
PF: predicated region fallthrough
CT: control target
= control target key end

     0   :  { %v312_v0 = vmov 0.0|0.0   ;;  %vm313_vm0 = vmmov 0   ;;  %v314_v4 = vmov 0.0   ;;  %vm34_vm1 = vcmask 261120   ;;  %s417_s1 = inlined_call_operand.vmem [shape: f32[32,128], index: 1, kind: input, shape index: {}]   ;;  %s418_s3 = inlined_call_operand.vmem [shape: f32[128,1], index: 3, kind: input, shape index: {}]   ;;  %s419_s0 = inlined_call_operand.vmem [shape: f32[8,32], index: 0, kind: input, shape index: {}]   ;;  %s420_s4 = inlined_call_operand.<no memory space> [shape: f32[1,1], index: 4, kind: input, shape index: {}]   ;;  %s421_s2 = inlined_call_operand.vmem [shape: f32[1,128], index: 2, kind: input, shape index: {}]   ;;  %s422_s5 = inlined_call_operand.vmem [shape: f32[8,1], index: 5, kind: output, shape index: {}]  }
   0x1   :  { %279 = vmatprep.subr.bf16.mxu0 %v312_v0  ;;  %v23_v1 = vld [vmem:[%s417_s1] sm:$0xff]  ;;  %v24_v2 = vld [vmem:[%s417_s1 + $0x8] sm:$0xff]  ;;  %v25_v3 = vld [vmem:[%s417_s1 + $0x10] sm:$0xff]  ;;  %241 = vmatprep.mubr.msk.f32.mxu0 %vm313_vm0, %v314_v4  ;;  %v10_v33 = vstv %s420_s4  ;;  %vm202_vm2 = vcmask 7168  }
   0x2   :  { %v280_v5 = vpack.c.bf16 %v24_v2, %v23_v1  ;;  %v26_v6 = vld [vmem:[%s417_s1 + $0x18] sm:$0xff]  ;;  %285 = vmatprep.subr.bf16.mxu1 %v312_v0  ;;  %v109_v7 = vld [vmem:[%s418_s3] sm:$0xff]  ;;  %276 = vmatprep.mubr.msk.f32.mxu1 %vm313_vm0, %v314_v4  ;;  %v110_v8 = vld [vmem:[%s418_s3 + $0x8] sm:$0xff]  ;;  %11 = vst [vmem:[#allocation2] sm:$0x1] %v10_v33 }
   0x3   :  { %v111_v9 = vld [vmem:[%s418_s3 + $0x10] sm:$0xff]  ;;  %v112_v10 = vld [vmem:[%s418_s3 + $0x18] sm:$0xff]  ;;  %v283_v11 = vpack.c.bf16 %v26_v6, %v25_v3  ;;  %v286_v12 = vpack.c.bf16 %v110_v8, %v109_v7  ;;  %v113_v14 = vld [vmem:[%s418_s3 + $0x20] sm:$0xff] }
   0x4   :  { %281 = vmatpush3.bf16.msra.mxu0 %v280_v5  ;;  %v289_v13 = vpack.c.bf16 %v112_v10, %v111_v9  ;;  %v114_v15 = vld [vmem:[%s418_s3 + $0x28] sm:$0xff]  ;;  %v22_v16 = vld [vmem:[%s419_s0] sm:$0xff]  ;;  %v115_v18 = vld [vmem:[%s418_s3 + $0x30] sm:$0xff] }
   0x5   :  { %282 = vmatprep.subr.bf16.mxu0 %v312_v0  ;;  %287 = vmatpush3.bf16.msra.mxu1 %v286_v12  ;;  %v292_v17 = vpack.c.bf16 %v114_v15, %v113_v14  ;;  %v116_v19 = vld [vmem:[%s418_s3 + $0x38] sm:$0xff]  ;;  %v117_v21 = vld [vmem:[%s418_s3 + $0x40] sm:$0xff]  ;;  %v118_v22 = vld [vmem:[%s418_s3 + $0x48] sm:$0xff] }
   0x6   :  { %288 = vmatprep.subr.bf16.mxu1 %v312_v0  ;;  %v295_v20 = vpack.c.bf16 %v116_v19, %v115_v18  ;;  %v298_v23 = vpack.c.bf16 %v118_v22, %v117_v21  ;;  %v119_v24 = vld [vmem:[%s418_s3 + $0x50] sm:$0xff]  ;;  %v120_v25 = vld [vmem:[%s418_s3 + $0x58] sm:$0xff]  ;;  %v121_v27 = vld [vmem:[%s418_s3 + $0x60] sm:$0xff] }
   0x7   :  { %v301_v26 = vpack.c.bf16 %v120_v25, %v119_v24  ;;  %v122_v28 = vld [vmem:[%s418_s3 + $0x68] sm:$0xff]  ;;  %v123_v30 = vld [vmem:[%s418_s3 + $0x70] sm:$0xff]  ;;  %v124_v31 = vld [vmem:[%s418_s3 + $0x78] sm:$0xff] }
   0x8   :  { %284 = vmatpush3.bf16.msra.mxu0 %v283_v11  ;;  %v304_v29 = vpack.c.bf16 %v122_v28, %v121_v27  ;;  %v307_v32 = vpack.c.bf16 %v124_v31, %v123_v30  ;;  %v208_v34 = vld [vmem:[%s421_s2] ss:$0 sm:$0xff] }
   0x9   :  { %290 = vmatpush3.bf16.msra.mxu1 %v289_v13  ;;  %v210_v39 = vld [vmem:[#allocation2] ss:$0 sm:$0xff] }
   0xa   :  { %291 = vmatprep.subr.bf16.mxu1 %v312_v0 }
   0xb   :  { %242 = vmatmul.mubr.msk.f32.vlgmr.msra.gmra.mrb[0].mxu0 %vm34_vm1, %v22_v16 }
   0xd   :  { %293 = vmatpush3.bf16.msra.mxu1 %v292_v17 }
   0xe   :  { %294 = vmatprep.subr.bf16.mxu1 %v312_v0 }
  0x11   :  { %296 = vmatpush3.bf16.msra.mxu1 %v295_v20 }
  0x12   :  { %297 = vmatprep.subr.bf16.mxu1 %v312_v0 }
  0x15   :  { %299 = vmatpush3.bf16.msra.mxu1 %v298_v23 }
  0x16   :  { %300 = vmatprep.subr.bf16.mxu1 %v312_v0 }
  0x19   :  { %302 = vmatpush3.bf16.msra.mxu1 %v301_v26 }
  0x1a   :  { %303 = vmatprep.subr.bf16.mxu1 %v312_v0 }
  0x1d   :  { %305 = vmatpush3.bf16.msra.mxu1 %v304_v29 }
  0x1e   :  { %306 = vmatprep.subr.bf16.mxu1 %v312_v0 }
  0x21   :  { %308 = vmatpush3.bf16.msra.mxu1 %v307_v32 }
  0xde   :  { %v104_v35 = vpop.f32.mrb[0].mxu0 }
  0xdf   :  { %v105_v36 = vadd.f32 %v208_v34, %v104_v35  ;;  %v243_v37 = vpop.f32.mrb[1].mxu0 }
  0xe1   :  { %v108_v38 = vmax.f32 %v105_v36, 0.0 }
  0xe3   :  { %277 = vmatmul.mubr.f32.vlgmr.msra.gmra.mrb[0].mxu1 %v108_v38 }
 0x1b6   :  { %v198_v40 = vpop.f32.mrb[0].mxu1 }
 0x1b7   :  { %v199_v41 = vadd.f32 %v210_v39, %v198_v40  ;;  %v278_v42 = vpop.f32.mrb[1].mxu1 }
 0x1b9   :  { %203 = vst.msk [vmem:[%s422_s5] sm:$0xff] %vm202_vm2, %v199_v41 }

</bundles_post_ra>
